<compile_context>
chip_gen: v6e
topology: v6e:2x2x1
jax: 0.10.0
libtpu: 0.0.40
codegen_flags: <defaults>
</compile_context>

<pallas_src>
import functools

import jax
import jax.numpy as jnp
from jax.experimental import pallas as pl
from jax.experimental.pallas import tpu as pltpu


def _cdiv(a, b):
    return -(-a // b)


def _round_up(a, b):
    return _cdiv(a, b) * b


def _l2norm_kernel(x_ref, w_ref, o_ref, *, eps):
    # x_ref: (1, C, T) block of the (B, C, HW) activation; w_ref: (C, 1) f32 scale.
    x = x_ref[0].astype(jnp.float32)                     # (C, T), compute in f32
    ssq = jnp.sum(x * x, axis=0, keepdims=True)          # (1, T) reduction over C
    inv = 1.0 / (jnp.sqrt(ssq) + eps)                    # exact: 1/(sqrt(.)+eps)
    o_ref[0] = (x * inv * w_ref[...]).astype(o_ref.dtype)  # (C,T)*(1,T)*(C,1)


def _choose_spatial_tile(batch, channels, hw, itemsize, target_bytes=2 << 20):
    """Byte-budgeted, lane-dense (multiple-of-128) spatial tile size."""
    sub = 8 if itemsize >= 4 else 16                 # f32 / bf16 sublane packing
    c_pad = max(_round_up(channels, sub), sub)       # real VMEM footprint of C rows
    t = (target_bytes // (c_pad * itemsize)) // 128 * 128
    t = max(128, int(t))
    if t >= hw:
        # Whole spatial extent fits inside one budgeted block.
        small = channels * hw * itemsize <= (512 << 10)
        if batch >= 2 or small or hw < 256:
            return hw                                 # full-extent block (always legal)
        # B == 1 and a big map: split so both v7x TensorCores get grid work.
        t = _round_up(_cdiv(hw, 2), 128)
    return t


def l2norm_pallas(x, weight, eps=1e-10):
    """x: (B, C, H, W) float32/bfloat16 (NCHW, like PyTorch); weight: (C,)."""
    B, C, H, W = x.shape
    HW = H * W
    itemsize = jnp.dtype(x.dtype).itemsize
    T = _choose_spatial_tile(B, C, HW, itemsize)
    n_tiles = _cdiv(HW, T)

    x_flat = x.reshape(B, C, HW)                  # contiguous reshape: no data movement
    w2 = weight.reshape(C, 1).astype(jnp.float32)

    # Explicit VMEM budget: double-buffered in+out blocks plus f32 intermediates,
    # with headroom; kept <= 64 MiB so it is valid on v7x as well.
    block_bytes_f32 = max(_round_up(C, 8), 8) * max(T, 128) * 4
    vmem_limit = int(min(64 << 20, max(32 << 20, 8 * block_bytes_f32)))

    out_flat = pl.pallas_call(
        functools.partial(_l2norm_kernel, eps=eps),
        out_shape=jax.ShapeDtypeStruct((B, C, HW), x.dtype),
        grid_spec=pltpu.PrefetchScalarGridSpec(
            num_scalar_prefetch=0,
            grid=(B, n_tiles),
            in_specs=[
                pl.BlockSpec((1, C, T), lambda b, q: (b, 0, q)),  # activation tile
                pl.BlockSpec((C, 1), lambda b, q: (0, 0)),        # per-channel scale
            ],
            out_specs=pl.BlockSpec((1, C, T), lambda b, q: (b, 0, q)),
        ),
        compiler_params=pltpu.CompilerParams(
            dimension_semantics=("parallel", "parallel"),
            vmem_limit_bytes=vmem_limit),
    )(x_flat, w2)

    return out_flat.reshape(B, C, H, W)


def l2norm_ref(x, weight, eps=1e-10):
    """Pure-JAX reference mirroring the PyTorch forward exactly (f32)."""
    x = x.astype(jnp.float32)
    norm = jnp.sqrt(jnp.sum(x * x, axis=1, keepdims=True)) + eps
    return weight[None, :, None, None] * (x / norm)


if __name__ == "__main__":
    scale = 20.0                                   # L2Norm(n_channels, scale=20)

    # 1) Canonical small shape, f32, HW a multiple of 128.
    B, C, H, W = 2, 4, 16, 16
    key = jax.random.PRNGKey(0)
    x = jax.random.normal(key, (B, C, H, W), jnp.float32)
    weight = jnp.full((C,), scale, jnp.float32)    # reset_parameters(): constant(gamma)

    y = jax.block_until_ready(l2norm_pallas(x, weight))
    y_ref = l2norm_ref(x, weight)
    assert y.shape == x.shape and y.dtype == x.dtype
    assert jnp.allclose(y, y_ref, atol=1e-5, rtol=1e-5), (
        float(jnp.max(jnp.abs(y - y_ref))))

    # 2) HW not a multiple of 128 (13*13 = 169): exercises the full-extent-block /
    #    non-divisible-spatial path.
    x2 = jax.random.normal(jax.random.PRNGKey(1), (1, 6, 13, 13), jnp.float32)
    w6 = jnp.full((6,), scale, jnp.float32)
    y2 = jax.block_until_ready(l2norm_pallas(x2, w6))
    assert jnp.allclose(y2, l2norm_ref(x2, w6), atol=1e-5, rtol=1e-5)

    # 3) bf16 activations end-to-end (half the HBM traffic); compare against the f32
    #    reference evaluated on the bf16-rounded input, so only the output cast differs.
    xb = jax.random.normal(jax.random.PRNGKey(2), (2, 4, 16, 16), jnp.float32)
    xb16 = xb.astype(jnp.bfloat16)
    yb = jax.block_until_ready(l2norm_pallas(xb16, weight))
    assert yb.dtype == jnp.bfloat16
    assert jnp.allclose(yb.astype(jnp.float32),
                        l2norm_ref(xb16.astype(jnp.float32), weight),
                        atol=0.15, rtol=0.02)

    print("KERNEL_OK")
</pallas_src>

<mosaic_0001>
module attributes {stable_mosaic.version = 11 : i64} {
  func.func @_l2norm_kernel(%arg0: i32, %arg1: i32, %arg2: memref<1x4x256xf32, #tpu.memory_space<vmem>>, %arg3: memref<4x1xf32, #tpu.memory_space<vmem>>, %arg4: memref<1x4x256xf32, #tpu.memory_space<vmem>>) attributes {dimension_semantics = [#tpu.dimension_semantics<parallel>, #tpu.dimension_semantics<parallel>], iteration_bounds = array<i64: 2, 1>, scalar_prefetch = 0 : i64, scratch_operands = 0 : i64, tpu.core_type = #tpu.core_type<tc>, window_params = [{transform_indices = @transform_0, window_bounds = array<i64: 1, 4, 256>}, {pipeline_mode = #tpu.pipeline_mode<synchronous>, transform_indices = @transform_1, window_bounds = array<i64: 4, 1>}, {transform_indices = @transform_2, window_bounds = array<i64: 1, 4, 256>}]} {
    %c0 = arith.constant 0 : index
    %c0_0 = arith.constant 0 : index
    %c0_1 = arith.constant 0 : index
    %0 = vector.load %arg2[%c0, %c0_0, %c0_1] : memref<1x4x256xf32, #tpu.memory_space<vmem>>, vector<1x4x256xf32>
    %1 = vector.shape_cast %0 : vector<1x4x256xf32> to vector<4x256xf32>
    %2 = arith.mulf %1, %1 : vector<4x256xf32>
    %cst = arith.constant dense<0.000000e+00> : vector<256xf32>
    %3 = vector.multi_reduction <add>, %2, %cst [0] : vector<4x256xf32> to vector<256xf32>
    %4 = vector.shape_cast %3 : vector<256xf32> to vector<1x256xf32>
    %5 = math.sqrt %4 : vector<1x256xf32>
    %cst_2 = arith.constant 1.000000e-10 : f32
    %6 = vector.broadcast %cst_2 : f32 to vector<1x256xf32>
    %7 = arith.addf %5, %6 : vector<1x256xf32>
    %cst_3 = arith.constant 1.000000e+00 : f32
    %8 = vector.broadcast %cst_3 : f32 to vector<1x256xf32>
    %9 = arith.divf %8, %7 : vector<1x256xf32>
    %10 = vector.broadcast %9 : vector<1x256xf32> to vector<4x256xf32>
    %11 = arith.mulf %1, %10 : vector<4x256xf32>
    %c0_4 = arith.constant 0 : index
    %c0_5 = arith.constant 0 : index
    %12 = vector.load %arg3[%c0_4, %c0_5] : memref<4x1xf32, #tpu.memory_space<vmem>>, vector<4x1xf32>
    %13 = vector.broadcast %12 : vector<4x1xf32> to vector<4x256xf32>
    %14 = arith.mulf %11, %13 : vector<4x256xf32>
    %c0_6 = arith.constant 0 : index
    %c0_7 = arith.constant 0 : index
    %c0_8 = arith.constant 0 : index
    %15 = vector.load %arg4[%c0_6, %c0_7, %c0_8] : memref<1x4x256xf32, #tpu.memory_space<vmem>>, vector<1x4x256xf32>
    %16 = vector.shape_cast %15 : vector<1x4x256xf32> to vector<4x256xf32>
    %17 = vector.shape_cast %14 : vector<4x256xf32> to vector<1x4x256xf32>
    tpu.vector_store %arg4[%c0_6, %c0_7, %c0_8], %17 {strides = array<i32>} : memref<1x4x256xf32, #tpu.memory_space<vmem>>, vector<1x4x256xf32>,
    return
  }
  func.func @transform_0(%arg0: i32, %arg1: i32) -> (i32, i32, i32) {
    %c0_i32 = arith.constant 0 : i32
    %c0_i32_0 = arith.constant 0 : i32
    return %arg0, %c0_i32, %arg1 : i32, i32, i32
  }
  func.func @transform_1(%arg0: i32, %arg1: i32) -> (i32, i32) {
    %c0_i32 = arith.constant 0 : i32
    %c0_i32_0 = arith.constant 0 : i32
    %c0_i32_1 = arith.constant 0 : i32
    return %c0_i32, %c0_i32_0 : i32, i32
  }
  func.func @transform_2(%arg0: i32, %arg1: i32) -> (i32, i32, i32) {
    %c0_i32 = arith.constant 0 : i32
    %c0_i32_0 = arith.constant 0 : i32
    return %arg0, %c0_i32, %arg1 : i32, i32, i32
  }
}

</mosaic_0001>

<bundles_post_ra>
// kernel: tpu_custom_call.1
= control target key start
LH: loop header
LB: loop body
LE: loop exit
PB: predicated region body
PF: predicated region fallthrough
CT: control target
= control target key end

     0   :  { %7 = vsyncpa [#allocation3], 0  ;;  %s701_s0 = inlined_call_operand.hbm [shape: f32[2,4,256], index: 0, kind: input, shape index: {}]   ;;  %s702_s1 = inlined_call_operand.vmem [shape: f32[4,1], index: 1, kind: input, shape index: {}]   ;;  %s703_s2 = inlined_call_operand.hbm [shape: f32[2,4,256], index: 2, kind: output, shape index: {}]  }
   0x1   :  { %9 = vsyncpa [#allocation3 + $0x1], 0 }
   0x2   :  { %10 = vsyncpa [#allocation4], 0 }
   0x3   :  { %12 = vsyncpa [#allocation4 + $0x1], 0  ;;  %s560_s9 = smov 0   ;;  %s562_s10 = smov 0  }
   0x4   :  { %s564_s11 = smov 0   ;;  %s566_s12 = smov 0  }
   0x5   :  { %s568_s13 = smov 0   ;;  %s570_s14 = smov 0  }
   0x6 LB: > { %s341_s15 = sadd.s32 4294967295, %s539_s14   ;;  %s342_s16 = sadd.s32 4294967294, %s539_s14   ;;  %s539_s14 = sphi %s570_s14, %s18_s14   ;;  %s535_s13 = sphi %s568_s13, %s715_s13   ;;  %s531_s12 = sphi %s566_s12, %s714_s12   ;;  %s527_s11 = sphi %s564_s11, %s713_s11   ;;  %s523_s10 = sphi %s562_s10, %s712_s10   ;;  %s519_s9 = sphi %s560_s9, %s711_s9  }
   0x7   : > { %s30_s17 = sadd.s32 1, %s535_s13  ;;  %s39_s18 = sadd.s32 1, %s527_s11 }
   0x8   : > { %p32_p0 = scmp.ge.s32.totalorder %s30_s17, 2  ;;  %p46_p1 = scmp.ne.s32.totalorder %s527_s11, %s523_s10 }
   0x9   : > { %p47_p2 = scmp.eq.s32.totalorder %s539_s14, 0  ;;  %p52_p3 = scmp.ne.s32.totalorder %s523_s10, %s519_s9 }
   0xa   : > { %s717_s17 = smov (%p32_p0, %s30_s17), 0  ;;  %p53_p5 = scmp.eq.s32.totalorder %s341_s15, 0 }
   0xb   : > { %p601_p4 = por %p47_p2, %p46_p1  ;;  %s34_s20 = ssub.s32 %s535_s13, %s717_s17 }
   0xc   : > { %p99_p6 = scmp.eq.s32.totalorder %s341_s15, 1  ;;  %p37_p7 = scmp.eq.s32.totalorder %s34_s20, 0 }
   0xd   : > { %p607_p8 = por %p53_p5, %p52_p3  ;;  %p105_p10 = scmp.eq.s32.totalorder %s342_s16, 1 }
   0xe   : > { %p611_p9 = por %p99_p6, %p46_p1  ;;  %p370_p13 = scmp.lt.s32.totalorder %s539_s14, 2 }
   0xf   : > { %s616_s23 = scalar_select %p37_p7, %s527_s11, %s39_s18  }
  0x10   : > { %p618_p11 = por %p105_p10, %p52_p3  ;;  %s128_s25 = sand.u32 1, %s527_s11  }
  0x11   : > { %s345_s26 = sshll.u32 %s128_s25, 3  ;;  %s356_s27 = sshll.u32 %s535_s13, 7 }
  0x12   : > { %s707_s24 = scalar_select %p618_p11, 1, 0 }
  0x13   : > { %s140_s30 = scalar_lea.hbm %s701_s0, %s356_s27  ;;  %s132_s3 = scalar_lea.vmem [#allocation2], %s345_s26 }
  0x14   : > { %s142_s4 = sshll.u32 %s132_s3, 4  ;;  %p631_p0 = pnand %p370_p13, %p601_p4  ;;  %s143_s4 = int_to_ptr.vmem [resolvable:$true] %s142_s4 }
  0x15   : > { %p348_p1 = scmp.ge.s32.totalorder %s539_s14, 1  ;;  %p147_p2 = scmp.lt.s32.totalorder %s539_s14, 3 }
  0x16   : > { %s129_s6 = scalar_lea.sflag [#allocation3], %s128_s25  ;;  %p433_p3 = pneg %p631_p0 }
  0x17   : > { %s444_s7 = scalar_lea.vmem %s143_s4, 128  ;;  %s541_s8 = smov [#allocation2]  }
  0x18   : > { %p445_p5 = scmp.ne.s32.totalorder %s143_s4, %s444_s7  ;;  %s449_s15 = sshll.u32 %s541_s8, 4  ;;  %s450_s15 = int_to_ptr.vmem [resolvable:$false] %s449_s15 }
  0x19   : > { %s451_s16 = scalar_lea.vmem %s450_s15, 256  ;;  %p452_p10 = scmp.lt.s32.totalorder %s143_s4, %s450_s15 }
  0x1a   : > { %p447_p6 = pnand %p445_p5, %p433_p3  ;;  %p453_p12 = scmp.lt.s32.totalorder %s451_s16, %s444_s7 }
  0x1c   : > { %p448_p7 = pneg %p447_p6  ;;  %p454_p4 = por %p453_p12, %p452_p10 }
  0x1e   : > { %p455_p13 = pnand %p454_p4, %p448_p7 }
  0x20   : > { %458 = shalt.err (!%p455_p13)
}
  0x21   : > { %365 = dma.hbm_to_vmem [thread:$0]  (!%p631_p0), %s140_s30, 128, %s143_s4, %s129_s6  }
  0x22   : > { %p148_p11 = pnand %p348_p1, %p147_p2 }
  0x23   : > { %s646_s18 = sand.u32 (!%p148_p11), 1, %s523_s10  }
  0x24   : > { %151 = sbr.rel (%p148_p11) target bundleno = 185 (0xb9), region = 28  ;;  %s349_s19 = sshll.u32 (!%p148_p11), %s646_s18, 3 }
  0x25   : > { %s154_s20 = scalar_lea.sflag (!%p148_p11), [#allocation3], %s646_s18  ;;  %s157_s25 = scalar_lea.vmem (!%p148_p11), [#allocation2], %s349_s19 }
  0x29   : > { %510 = dma.done.wait (%p607_p8), %s154_s20, 128  }
  0x2a   : > { %512 = vsyncadd (%p607_p8), %s154_s20, 4294967168  ;;  %v542_v0 = vmov 0   ;;  %v225_v1 = vld [vmem:[%s702_s1] sm:$0xf]  ;;  %vm185_vm0 = vcmask 1043456   ;;  %v233_v33 = vlaneseq  ;;  %s357_s21 = sshll.u32 %s531_s12, 7 }
  0x2b   : > { %422 = vset.pattern.permute.xlu0 %v542_v0  ;;  %v180_v2 = vld [vmem:[%s157_s25] sm:$0xff]  ;;  %v543_v31 = vmov 839922192   ;;  %s177_s28 = scalar_lea.vmem [#allocation5], %s349_s19  ;;  %s255_s4 = scalar_lea.hbm %s703_s2, %s357_s21 }
  0x2c   : > { %228 = vperm.xlu0 %422, %v225_v1   ;;  %v181_v3 = vmul.f32 %v180_v2, %v180_v2  ;;  %v231_v32 = vunpack.c.l.s4 %v543_v31  ;;  %v234_v37 = vshrl.u32 %v233_v33, 7  ;;  %s257_s29 = sshll.u32 %s177_s28, 4  ;;  %s241_s5 = scalar_lea.sflag [#allocation4], %s646_s18  ;;  %s258_s29 = int_to_ptr.vmem [resolvable:$true] %s257_s29 }
  0x2d   : > { %s459_s6 = scalar_lea.vmem %s258_s29, 128  ;;  %s544_s7 = smov [#allocation5]  }
  0x2e   : > { %v183_v4 = vcombine.high %v181_v3, %v181_v3  ;;  %v186_v5 = vsel %vm185_vm0, %v181_v3, 0.0  ;;  %v232_v36 = vunpack.c.0.s8 %v231_v32  ;;  %p460_p8 = scmp.ne.s32.totalorder %s258_s29, %s459_s6  ;;  %s463_s8 = sshll.u32 %s544_s7, 4  ;;  %s464_s8 = int_to_ptr.vmem [resolvable:$false] %s463_s8 }
  0x2f   : > { %v187_v7 = vrot.slane %v186_v5, 4  ;;  %s465_s12 = scalar_lea.vmem %s464_s8, 256  ;;  %p466_p0 = scmp.lt.s32.totalorder %s258_s29, %s464_s8 }
  0x30   : > { %v193_v6 = vsel %vm185_vm0, %v183_v4, 0.0  ;;  %v235_v39 = vsub.s32 %v232_v36, %v234_v37  ;;  %p461_p11 = pnand %p460_p8, %p611_p9  ;;  %p467_p1 = scmp.lt.s32.totalorder %s465_s12, %s459_s6 }
  0x31   : > { %v194_v8 = vrot.slane %v193_v6, 4  ;;  %v188_v9 = vadd.f32 %v187_v7, %v186_v5 }
  0x32   : > { %p462_p12 = pneg %p461_p11  ;;  %p468_p2 = por %p467_p1, %p466_p0 }
  0x33   : > { %v195_v10 = vadd.f32 %v194_v8, %v193_v6  ;;  %v189_v11 = vrot.slane %v188_v9, 2 }
  0x34   : > { %p469_p3 = pnand %p468_p2, %p462_p12 }
  0x35   : > { %v196_v12 = vrot.slane %v195_v10, 2  ;;  %v190_v13 = vadd.f32 %v189_v11, %v188_v9 }
  0x37   : > { %v197_v14 = vadd.f32 %v196_v12, %v195_v10  ;;  %v191_v15 = vrot.slane %v190_v13, 1 }
  0x39   : > { %v198_v16 = vrot.slane %v197_v14, 1  ;;  %v192_v17 = vadd.f32 %v191_v15, %v190_v13 }
  0x3b   : > { %v199_v18 = vadd.f32 %v198_v16, %v197_v14  ;;  %423 = vrsqrt.f32 %v192_v17  ;;  %vm202_vm1 = vcmp.eq.f32.partialorder %v192_v17, inf  ;;  %v205_v23 = vand.u32 2147483648, %v192_v17 }
  0x3c   : > { %vm204_vm3 = vcmp.eq.f32.partialorder %v192_v17, 0.0 }
  0x3d   : > { %425 = vrsqrt.f32 %v199_v18  ;;  %vm209_vm2 = vcmp.eq.f32.partialorder %v199_v18, inf  ;;  %v212_v25 = vand.u32 2147483648, %v199_v18  ;;  %vm211_vm4 = vcmp.eq.f32.partialorder %v199_v18, 0.0 }
  0x48   : > { %v424_v19 = vpop.eup %423 }
  0x49   : > { %v201_v21 = vmul.f32 %v424_v19, %v192_v17 }
  0x4a   : > { %v426_v20 = vpop.eup %425 }
  0x4b   : > { %v208_v22 = vmul.f32 %v426_v20, %v199_v18  ;;  %v203_v24 = vsel %vm202_vm1, %v192_v17, %v201_v21 }
  0x4c   : > { %v206_v27 = vsel %vm204_vm3, %v205_v23, %v203_v24 }
  0x4d   : > { %v210_v26 = vsel %vm209_vm2, %v199_v18, %v208_v22  ;;  %v214_v29 = vadd.f32 1e-10, %v206_v27 }
  0x4e   : > { %v213_v28 = vsel %vm211_vm4, %v212_v25, %v210_v26 }
  0x4f   : > { %v215_v30 = vadd.f32 1e-10, %v213_v28  ;;  %427 = vrcp.f32 %v214_v29 }
  0x51   : > { %429 = vrcp.f32 %v215_v30 }
  0x5c   : > { %v428_v34 = vpop.eup %427 }
  0x5e   : > { %v430_v35 = vpop.eup %429 }
  0x5f   : > { %v222_v38 = vcombine.low %v428_v34, %v430_v35 }
  0x61   : > { %v224_v40 = vmul.f32 %v222_v38, %v180_v2 }
  0xa7   : > { %v229_v41 = vpop.permute.xlu0 %228 }
  0xa8   : > { %v236_v42 = vrot.slane %v229_v41, %v235_v39 }
  0xaa   : > { %v238_v43 = vmul.f32 %v236_v42, %v224_v40 }
  0xac   : > { %239 = vst [vmem:[%s177_s28] sm:$0xff] %v238_v43 }
  0xad   : > { %472 = shalt.err (!%p469_p3)
}
  0xae   : > { %s473_s15 = scalar_lea.hbm %s255_s4, 128  ;;  %s477_s19 = scalar_lea.hbm %s703_s2, 256 }
  0xaf   : > { %p474_p5 = scmp.ne.s32.totalorder %s255_s4, %s473_s15  ;;  %p478_p10 = scmp.lt.s32.totalorder %s255_s4, %s703_s2 }
  0xb0   : > { %p479_p4 = scmp.lt.s32.totalorder %s477_s19, %s473_s15 }
  0xb1   : > { %p475_p6 = pnand %p474_p5, %p611_p9 }
  0xb2   : > { %p480_p13 = por %p479_p4, %p478_p10 }
  0xb3   : > { %p476_p7 = pneg %p475_p6 }
  0xb5   : > { %p481_p8 = pnand %p480_p13, %p476_p7 }
  0xb7   : > { %484 = shalt.err (!%p481_p8)
}
  0xb8   : > { %360 = dma.vmem_to_hbm [thread:$0]  (%p611_p9), %s258_s29, 128, %s255_s4, %s241_s5  }
  0xb9 PF: > { %s269_s26 = sand.u32 1, %s519_s9   ;;  %p709_p11 = scmp.ne.s32.totalorder %s707_s24, 0 }
  0xba   : > { %p710_p12 = scmp.ge.s32.totalorder %s539_s14, 2  ;;  %s270_s27 = scalar_lea.sflag [#allocation4], %s269_s26 }
  0xbc   : > { %p367_p0 = pnand %p710_p12, %p709_p11 }
  0xbe   : > { %p368_p1 = pneg %p367_p0 }
  0xc0   : > { %514 = dma.done.wait (%p368_p1), %s270_s27, 128  }
  0xc1   : > { %516 = vsyncadd (%p368_p1), %s270_s27, 4294967168  ;;  %s18_s14 = sadd.s32 1, %s539_s14   ;;  %s711_s9 = smov %s523_s10 }
  0xc2   : > { %p15_p2 = scmp.ge.s32.totalorder %s18_s14, 4   ;;  %s712_s10 = smov %s527_s11 }
  0xc3   : > { %s713_s11 = smov %s616_s23  ;;  %s714_s12 = smov %s535_s13 }
  0xc4   : > { %s715_s13 = smov %s717_s17  ;;  %17 = sbr.rel (!%p15_p2) target bundleno = 6 (0x6), region = 73 }
  0xc9   :  { %275 = vsyncpa [#allocation3], 1 }
  0xca   :  { %277 = vsyncpa [#allocation3 + $0x1], 1 }
  0xcb   :  { %278 = vsyncpa [#allocation4], 1 }
  0xcc   :  { %280 = vsyncpa [#allocation4 + $0x1], 1 }

</bundles_post_ra>
